<compile_context>
chip_gen: v7x
topology: tpu7x:2x2x1
jax: 0.10.0
libtpu: 0.0.40
codegen_flags: <defaults>
</compile_context>

<pallas_src>
import jax
import jax.numpy as jnp
import numpy as np
from jax.experimental import pallas as pl
from jax.experimental.pallas import tpu as pltpu

B = 2       # batch
S = 8       # sequence length ("longest" padding)
H = 1024    # Flaubert large hidden size (fc_classif expects 1024)
C = 2       # number of classes


def head_kernel(h_ref, inv_ref, wd_ref, bd_ref, out_ref):
    # h_ref:   (B, S, H) last hidden state (VMEM)
    # inv_ref: (B, 1)    1 / token_count per batch row (VMEM)
    # wd_ref:  (1, H)    w_diff = w[0] - w[1] (VMEM)
    # bd_ref:  (1,)      b_diff = b[0] - b[1] (SMEM scalar)
    # out_ref: (B, C)    softmax probabilities (VMEM)

    # --- pooling: sum over seq (sublane/XLU reduce), then scale by 1/count ---
    # (matches the torch code: padded positions ARE included in the sum, only
    #  the denominator uses the mask)
    summed = jnp.sum(h_ref[...], axis=1)                              # (B, H)
    pooled = summed * inv_ref[...]                                    # (B, H)

    # --- F.normalize factor: rsqrt(max(||x||^2, eps^2)), eps = 1e-12 --------
    sumsq = jnp.sum(pooled * pooled, axis=1, keepdims=True)           # (B, 1)
    inv_norm = jax.lax.rsqrt(jnp.maximum(sumsq, 1e-24))               # EUP

    # --- classifier + softmax collapsed into one difference projection ------
    # d = z . (w0 - w1) + (b0 - b1) == logits[0] - logits[1],
    # with z = pooled * inv_norm; the per-row inv_norm folds into the scalar.
    dot = jnp.sum(pooled * wd_ref[...], axis=1, keepdims=True)        # (B, 1)
    d = dot * inv_norm + bd_ref[0]                                    # (B, 1)

    # softmax over 2 classes: p0 = sigmoid(l0 - l1), p1 = 1 - p0
    p0 = jax.nn.sigmoid(d)                                            # EUP
    p1 = 1.0 - p0
    out_ref[:, 0:1] = p0
    out_ref[:, 1:2] = p1


@jax.jit
def net_head(hidden, attn_mask, w, b):
    Bv, Sv, Hv = hidden.shape
    Cv = w.shape[0]
    assert Cv == 2, "difference-projection head assumes 2 classes"

    # Tiny wrapper-side preps (all O(B) / O(H)):
    inv_counts = (1.0 / jnp.sum(attn_mask, axis=1)).reshape(Bv, 1)    # (B, 1)
    w_diff = (w[0, :] - w[1, :]).reshape(1, Hv)                       # (1, H)
    b_diff = (b[0] - b[1]).reshape(1)                                 # (1,)

    return pl.pallas_call(
        head_kernel,
        out_shape=jax.ShapeDtypeStruct((Bv, Cv), jnp.float32),
        in_specs=[
            pl.BlockSpec(memory_space=pltpu.MemorySpace.VMEM),   # hidden (B,S,H)
            pl.BlockSpec(memory_space=pltpu.MemorySpace.VMEM),   # 1/count (B,1)
            pl.BlockSpec(memory_space=pltpu.MemorySpace.VMEM),   # w_diff (1,H)
            pl.BlockSpec(memory_space=pltpu.MemorySpace.SMEM),   # b_diff scalar
        ],
        out_specs=pl.BlockSpec(memory_space=pltpu.MemorySpace.VMEM),
    )(hidden, inv_counts, w_diff, b_diff)


def reference(hidden, attn_mask, w, b):
    pooled = jnp.sum(hidden, axis=1) / jnp.sum(attn_mask, axis=1, keepdims=True)
    norm = jnp.sqrt(jnp.sum(pooled * pooled, axis=1, keepdims=True))
    x = pooled / jnp.maximum(norm, 1e-12)
    logits = x @ w.T + b[None, :]
    return jax.nn.softmax(logits, axis=1)


if __name__ == "__main__":
    key = jax.random.PRNGKey(0)
    k_h, k_w, k_b = jax.random.split(key, 3)

    # Synthetic "last hidden state" standing in for the Flaubert encoder output.
    hidden = jax.random.normal(k_h, (B, S, H), dtype=jnp.float32)

    # Attention mask with "longest" padding (example lengths: 8 and 5 tokens).
    lengths = jnp.array([8, 5], dtype=jnp.int32)
    attn_mask = (jnp.arange(S)[None, :] < lengths[:, None]).astype(jnp.float32)

    # Deterministic fc_classif parameters (nn.Linear(1024, 2) shapes).
    bound = 1.0 / np.sqrt(H)
    w = jax.random.uniform(k_w, (C, H), minval=-bound, maxval=bound,
                           dtype=jnp.float32)       # PyTorch layout (out, in)
    b = jax.random.uniform(k_b, (C,), minval=-bound, maxval=bound,
                           dtype=jnp.float32)

    out = net_head(hidden, attn_mask, w, b)
    out = jax.block_until_ready(out)

    ref = reference(hidden, attn_mask, w, b)
    np.testing.assert_allclose(np.asarray(out), np.asarray(ref),
                               rtol=1e-4, atol=1e-5)

    print("KERNEL_OK")
</pallas_src>

<mosaic_0001>
module attributes {stable_mosaic.version = 11 : i64} {
  func.func @head_kernel(%arg0: memref<2x8x1024xf32, #tpu.memory_space<vmem>>, %arg1: memref<2x1xf32, #tpu.memory_space<vmem>>, %arg2: memref<1x1024xf32, #tpu.memory_space<vmem>>, %arg3: memref<1xf32, #tpu.memory_space<smem>>, %arg4: memref<2x2xf32, #tpu.memory_space<vmem>>) attributes {dimension_semantics = [], scalar_prefetch = 0 : i64, scratch_operands = 0 : i64, tpu.core_type = #tpu.core_type<tc>} {
    %c0 = arith.constant 0 : index
    %c0_0 = arith.constant 0 : index
    %c0_1 = arith.constant 0 : index
    %0 = vector.load %arg0[%c0, %c0_0, %c0_1] : memref<2x8x1024xf32, #tpu.memory_space<vmem>>, vector<2x8x1024xf32>
    %cst = arith.constant dense<0.000000e+00> : vector<2x1024xf32>
    %1 = vector.multi_reduction <add>, %0, %cst [1] : vector<2x8x1024xf32> to vector<2x1024xf32>
    %c0_2 = arith.constant 0 : index
    %c0_3 = arith.constant 0 : index
    %2 = vector.load %arg1[%c0_2, %c0_3] : memref<2x1xf32, #tpu.memory_space<vmem>>, vector<2x1xf32>
    %3 = vector.broadcast %2 : vector<2x1xf32> to vector<2x1024xf32>
    %4 = arith.mulf %1, %3 : vector<2x1024xf32>
    %5 = arith.mulf %4, %4 : vector<2x1024xf32>
    %cst_4 = arith.constant dense<0.000000e+00> : vector<2xf32>
    %6 = vector.multi_reduction <add>, %5, %cst_4 [1] : vector<2x1024xf32> to vector<2xf32>
    %7 = vector.shape_cast %6 : vector<2xf32> to vector<2x1xf32>
    %cst_5 = arith.constant 1.000000e-24 : f32
    %8 = vector.broadcast %cst_5 : f32 to vector<2x1xf32>
    %9 = arith.maximumf %7, %8 : vector<2x1xf32>
    %10 = math.rsqrt %9 : vector<2x1xf32>
    %c0_6 = arith.constant 0 : index
    %c0_7 = arith.constant 0 : index
    %11 = vector.load %arg2[%c0_6, %c0_7] : memref<1x1024xf32, #tpu.memory_space<vmem>>, vector<1x1024xf32>
    %12 = vector.broadcast %11 : vector<1x1024xf32> to vector<2x1024xf32>
    %13 = arith.mulf %4, %12 : vector<2x1024xf32>
    %cst_8 = arith.constant dense<0.000000e+00> : vector<2xf32>
    %14 = vector.multi_reduction <add>, %13, %cst_8 [1] : vector<2x1024xf32> to vector<2xf32>
    %15 = vector.shape_cast %14 : vector<2xf32> to vector<2x1xf32>
    %16 = arith.mulf %15, %10 : vector<2x1xf32>
    %c0_9 = arith.constant 0 : index
    %17 = memref.load %arg3[%c0_9] : memref<1xf32, #tpu.memory_space<smem>>
    %18 = vector.broadcast %17 : f32 to vector<2x1xf32>
    %19 = arith.addf %16, %18 : vector<2x1xf32>
    %20 = arith.negf %19 : vector<2x1xf32>
    %21 = math.exp %20 : vector<2x1xf32>
    %cst_10 = arith.constant 1.000000e+00 : f32
    %22 = vector.broadcast %cst_10 : f32 to vector<2x1xf32>
    %23 = arith.addf %22, %21 : vector<2x1xf32>
    %24 = arith.divf %22, %23 : vector<2x1xf32>
    %cst_11 = arith.constant 1.000000e+00 : f32
    %25 = vector.broadcast %cst_11 : f32 to vector<2x1xf32>
    %26 = arith.subf %25, %24 : vector<2x1xf32>
    %c0_12 = arith.constant 0 : index
    %c0_13 = arith.constant 0 : index
    %27 = vector.load %arg4[%c0_12, %c0_13] : memref<2x2xf32, #tpu.memory_space<vmem>>, vector<2x1xf32>
    tpu.vector_store %arg4[%c0_12, %c0_13], %24 {strides = array<i32>} : memref<2x2xf32, #tpu.memory_space<vmem>>, vector<2x1xf32>,
    %c0_14 = arith.constant 0 : index
    %c1 = arith.constant 1 : index
    %28 = vector.load %arg4[%c0_14, %c1] : memref<2x2xf32, #tpu.memory_space<vmem>>, vector<2x1xf32>
    tpu.vector_store %arg4[%c0_14, %c1], %26 {strides = array<i32>} : memref<2x2xf32, #tpu.memory_space<vmem>>, vector<2x1xf32>,
    return
  }
}

</mosaic_0001>

<bundles_post_ra>
// kernel: net_head.1
= control target key start
LH: loop header
LB: loop body
LE: loop exit
PB: predicated region body
PF: predicated region fallthrough
CT: control target
= control target key end

     0   :  { %10 = vsyncpa [#allocation4], 0  ;;  %s609_s0 = inlined_call_operand.hbm [shape: f32[2,8,1024], index: 0, kind: input, shape index: {}]   ;;  %s610_s1 = inlined_call_operand.vmem [shape: f32[2,1], index: 1, kind: input, shape index: {}]   ;;  %s611_s2 = inlined_call_operand.vmem [shape: f32[1,1024], index: 2, kind: input, shape index: {}]   ;;  %s612_s3 = inlined_call_operand.<no memory space> [shape: f32[1], index: 3, kind: input, shape index: {}]   ;;  %s613_s4 = inlined_call_operand.hbm [shape: f32[2,2], index: 4, kind: output, shape index: {}]  }
   0x1   :  { %11 = vsyncpa [#allocation5], 0  ;;  %s452_s15 = smov [#allocation3]   ;;  %s404_s19 = scalar_lea.hbm %s609_s0, 2048 }
   0x2   :  { %s17_s16 = sshll.u32 %s452_s15, 4  ;;  %p405_p0 = scmp.ne.s32.totalorder %s609_s0, %s404_s19  ;;  %s18_s16 = int_to_ptr.vmem [resolvable:$true] %s17_s16 }
   0x3   :  { %p408_p1 = scmp.lt.u32.totalorder %s404_s19, %s609_s0 }
   0x5   :  { %p410_p2 = pnand %p408_p1, %p405_p0 }
   0x7   :  { %413 = shalt.err (!%p410_p2)
}
   0x8   :  { %s414_s24 = scalar_lea.vmem %s18_s16, 2048  ;;  %p419_p4 = scmp.lt.s32.totalorder %s18_s16, %s18_s16 }
   0x9   :  { %p415_p3 = scmp.ne.s32.totalorder %s18_s16, %s414_s24  ;;  %p420_p5 = scmp.lt.s32.totalorder %s414_s24, %s414_s24 }
   0xb   :  { %p421_p6 = por %p420_p5, %p419_p4 }
   0xd   :  { %p422_p7 = pnand %p421_p6, %p415_p3 }
   0xf   :  { %425 = shalt.err (!%p422_p7)
}
  0x10   :  { %s453_s25 = smov 1024   ;;  %s454_s26 = smov 64  }
  0x11   :  { %23 = dma.hbm_to_vmem [thread:$0]  %s609_s0, 2048, %s18_s16, [#allocation4], %s453_s25, %s453_s25, %s454_s26  }
  0x12   :  { %448 = dma.done.wait [#allocation4], 2048  }
  0x13   :  { %449 = vsyncadd [#allocation4], 4294965248  ;;  %v455_v0 = vmov 0   ;;  %v145_v1 = vld [vmem:[%s610_s1] sm:$0x3]  ;;  %v248_v2 = vlaneseq  ;;  %v34_v4 = vld [vmem:[#allocation3 + $0x8] sm:$0xff] }
  0x14   :  { %397 = vset.pattern.permute.xlu0 %v455_v0  ;;  %v33_v3 = vld [vmem:[#allocation3] sm:$0xff]  ;;  %v35_v5 = vld [vmem:[#allocation3 + $0x10] sm:$0xff]  ;;  %v36_v6 = vld [vmem:[#allocation3 + $0x18] sm:$0xff]  ;;  %v55_v13 = vrot.slane %v34_v4, 4  ;;  %vm202_vm0 = vcmask 1041409   ;;  %vm226_vm1 = vcmask 1041408  }
  0x15   :  { %148 = vperm.xlu0 %397, %v145_v1   ;;  %v37_v7 = vld [vmem:[#allocation3 + $0x20] sm:$0xff]  ;;  %v497_v8 = vshrl.u32 %v248_v2, 7  ;;  %v38_v9 = vld [vmem:[#allocation3 + $0x28] sm:$0xff]  ;;  %v39_v10 = vld [vmem:[#allocation3 + $0x30] sm:$0xff]  ;;  %v49_v12 = vrot.slane %v33_v3, 4  ;;  %v61_v16 = vrot.slane %v35_v5, 4 }
  0x16   :  { %v40_v11 = vld [vmem:[#allocation3 + $0x38] sm:$0xff]  ;;  %v41_v14 = vld [vmem:[#allocation3 + $0x40] sm:$0xff]  ;;  %v42_v15 = vld [vmem:[#allocation3 + $0x48] sm:$0xff]  ;;  %v67_v17 = vrot.slane %v36_v6, 4  ;;  %v73_v18 = vrot.slane %v37_v7, 4  ;;  %v79_v25 = vrot.slane %v38_v9, 4  ;;  %v56_v30 = vadd.f32 %v55_v13, %v34_v4 }
  0x17   :  { %v43_v19 = vld [vmem:[#allocation3 + $0x50] sm:$0xff]  ;;  %v44_v20 = vld [vmem:[#allocation3 + $0x58] sm:$0xff]  ;;  %v250_v21 = vsub.s32 0, %v497_v8  ;;  %v45_v22 = vld [vmem:[#allocation3 + $0x60] sm:$0xff]  ;;  %v85_v26 = vrot.slane %v39_v10, 4  ;;  %v91_v27 = vrot.slane %v40_v11, 4  ;;  %v50_v29 = vadd.f32 %v49_v12, %v33_v3 }
  0x18   :  { %v46_v23 = vld [vmem:[#allocation3 + $0x68] sm:$0xff]  ;;  %v47_v24 = vld [vmem:[#allocation3 + $0x70] sm:$0xff]  ;;  %v48_v28 = vld [vmem:[#allocation3 + $0x78] sm:$0xff]  ;;  %v97_v31 = vrot.slane %v41_v14, 4  ;;  %v103_v32 = vrot.slane %v42_v15, 4  ;;  %v62_v33 = vadd.f32 %v61_v16, %v35_v5  ;;  %v68_v34 = vadd.f32 %v67_v17, %v36_v6  ;;  %s456_s6 = smov [#allocation6]  }
  0x19   :  { %v74_v35 = vadd.f32 %v73_v18, %v37_v7  ;;  %v109_v36 = vrot.slane %v43_v19, 4  ;;  %v115_v37 = vrot.slane %v44_v20, 4  ;;  %v121_v38 = vrot.slane %v45_v22, 4  ;;  %s382_s7 = sshll.u32 %s456_s6, 4  ;;  %s383_s7 = int_to_ptr.vmem [resolvable:$true] %s382_s7 }
  0x1a   :  { %v127_v39 = vrot.slane %v46_v23, 4  ;;  %v133_v40 = vrot.slane %v47_v24, 4  ;;  %v80_v41 = vadd.f32 %v79_v25, %v38_v9  ;;  %v86_v42 = vadd.f32 %v85_v26, %v39_v10  ;;  %s426_s8 = scalar_lea.vmem %s383_s7, 32  ;;  %p431_p9 = scmp.lt.s32.totalorder %s383_s7, %s383_s7 }
  0x1b   :  { %v92_v43 = vadd.f32 %v91_v27, %v40_v11  ;;  %v139_v44 = vrot.slane %v48_v28, 4  ;;  %v51_v45 = vrot.slane %v50_v29, 2  ;;  %v57_v46 = vrot.slane %v56_v30, 2  ;;  %p427_p8 = scmp.ne.s32.totalorder %s383_s7, %s426_s8  ;;  %p432_p10 = scmp.lt.s32.totalorder %s426_s8, %s426_s8 }
  0x1c   :  { %v98_v47 = vadd.f32 %v97_v31, %v41_v14  ;;  %v104_v48 = vadd.f32 %v103_v32, %v42_v15  ;;  %v63_v49 = vrot.slane %v62_v33, 2  ;;  %v69_v50 = vrot.slane %v68_v34, 2 }
  0x1d   :  { %v75_v51 = vrot.slane %v74_v35, 2  ;;  %v110_v52 = vadd.f32 %v109_v36, %v43_v19  ;;  %v116_v53 = vadd.f32 %v115_v37, %v44_v20  ;;  %v122_v54 = vadd.f32 %v121_v38, %v45_v22  ;;  %p433_p11 = por %p432_p10, %p431_p9 }
  0x1e   :  { %v128_v55 = vadd.f32 %v127_v39, %v46_v23  ;;  %v134_v56 = vadd.f32 %v133_v40, %v47_v24  ;;  %v81_v57 = vrot.slane %v80_v41, 2  ;;  %v87_v58 = vrot.slane %v86_v42, 2 }
  0x1f   :  { %v93_v59 = vrot.slane %v92_v43, 2  ;;  %v140_v60 = vadd.f32 %v139_v44, %v48_v28  ;;  %v52_v61 = vadd.f32 %v51_v45, %v50_v29  ;;  %v58_v62 = vadd.f32 %v57_v46, %v56_v30  ;;  %p434_p12 = pnand %p433_p11, %p427_p8 }
  0x20   :  { %v99_v63 = vrot.slane %v98_v47, 2  ;;  %v105_v0 = vrot.slane %v104_v48, 2  ;;  %v64_v1 = vadd.f32 %v63_v49, %v62_v33  ;;  %v70_v2 = vadd.f32 %v69_v50, %v68_v34  ;;  %v246_v49 = vld [vmem:[%s611_s2] sm:$0xff] }
  0x21   :  { %v76_v3 = vadd.f32 %v75_v51, %v74_v35  ;;  %v111_v4 = vrot.slane %v110_v52, 2  ;;  %v117_v5 = vrot.slane %v116_v53, 2  ;;  %v123_v6 = vrot.slane %v122_v54, 2 }
  0x22   :  { %v129_v7 = vrot.slane %v128_v55, 2  ;;  %v135_v9 = vrot.slane %v134_v56, 2  ;;  %v82_v10 = vadd.f32 %v81_v57, %v80_v41  ;;  %v88_v11 = vadd.f32 %v87_v58, %v86_v42 }
  0x23   :  { %v94_v12 = vadd.f32 %v93_v59, %v92_v43  ;;  %v141_v13 = vrot.slane %v140_v60, 2  ;;  %v53_v14 = vrot.slane %v52_v61, 1  ;;  %v59_v15 = vrot.slane %v58_v62, 1 }
  0x24   :  { %v100_v16 = vadd.f32 %v99_v63, %v98_v47  ;;  %v106_v17 = vadd.f32 %v105_v0, %v104_v48  ;;  %v65_v18 = vrot.slane %v64_v1, 1  ;;  %v71_v19 = vrot.slane %v70_v2, 1 }
  0x25   :  { %v77_v20 = vrot.slane %v76_v3, 1  ;;  %v112_v22 = vadd.f32 %v111_v4, %v110_v52  ;;  %v118_v23 = vadd.f32 %v117_v5, %v116_v53  ;;  %v124_v24 = vadd.f32 %v123_v6, %v122_v54 }
  0x26   :  { %v130_v25 = vadd.f32 %v129_v7, %v128_v55  ;;  %v136_v26 = vadd.f32 %v135_v9, %v134_v56  ;;  %v83_v27 = vrot.slane %v82_v10, 1  ;;  %v89_v28 = vrot.slane %v88_v11, 1 }
  0x27   :  { %v95_v29 = vrot.slane %v94_v12, 1  ;;  %v142_v30 = vadd.f32 %v141_v13, %v140_v60  ;;  %v54_v31 = vadd.f32 %v53_v14, %v52_v61  ;;  %v60_v32 = vadd.f32 %v59_v15, %v58_v62 }
  0x28   :  { %v101_v33 = vrot.slane %v100_v16, 1  ;;  %v107_v34 = vrot.slane %v106_v17, 1  ;;  %v66_v35 = vadd.f32 %v65_v18, %v64_v1  ;;  %v72_v36 = vadd.f32 %v71_v19, %v70_v2 }
  0x29   :  { %v78_v37 = vadd.f32 %v77_v20, %v76_v3  ;;  %v113_v38 = vrot.slane %v112_v22, 1  ;;  %v119_v39 = vrot.slane %v118_v23, 1  ;;  %v125_v40 = vrot.slane %v124_v24, 1 }
  0x2a   :  { %v131_v41 = vrot.slane %v130_v25, 1  ;;  %v137_v42 = vrot.slane %v136_v26, 1  ;;  %v84_v43 = vadd.f32 %v83_v27, %v82_v10  ;;  %v90_v44 = vadd.f32 %v89_v28, %v88_v11 }
  0x2b   :  { %v96_v45 = vadd.f32 %v95_v29, %v94_v12  ;;  %v143_v46 = vrot.slane %v142_v30, 1  ;;  %v102_v47 = vadd.f32 %v101_v33, %v100_v16  ;;  %v108_v48 = vadd.f32 %v107_v34, %v106_v17 }
  0x2c   :  { %v254_v50 = vsub.s32 1, %v497_v8  ;;  %v258_v51 = vsub.s32 2, %v497_v8  ;;  %v114_v52 = vadd.f32 %v113_v38, %v112_v22  ;;  %v262_v53 = vsub.s32 3, %v497_v8 }
  0x2d   :  { %v266_v54 = vsub.s32 4, %v497_v8  ;;  %v270_v55 = vsub.s32 5, %v497_v8  ;;  %v120_v56 = vadd.f32 %v119_v39, %v118_v23  ;;  %v126_v57 = vadd.f32 %v125_v40, %v124_v24 }
  0x2e   :  { %v132_v58 = vadd.f32 %v131_v41, %v130_v25  ;;  %v138_v59 = vadd.f32 %v137_v42, %v136_v26  ;;  %v144_v61 = vadd.f32 %v143_v46, %v142_v30  ;;  %v251_v62 = vrot.slane %v246_v49, %v250_v21 }
  0x2f   :  { %v274_v63 = vsub.s32 6, %v497_v8  ;;  %v255_v1 = vrot.slane %v246_v49, %v254_v50  ;;  %v259_v2 = vrot.slane %v246_v49, %v258_v51  ;;  %v278_v3 = vsub.s32 7, %v497_v8 }
  0x30   :  { %v263_v5 = vrot.slane %v246_v49, %v262_v53  ;;  %v267_v6 = vrot.slane %v246_v49, %v266_v54  ;;  %v271_v7 = vrot.slane %v246_v49, %v270_v55  ;;  %vm372_vm2 = vcmask 1024  }
  0x31   :  { %v275_v8 = vrot.slane %v246_v49, %v274_v63  ;;  %v279_v18 = vrot.slane %v246_v49, %v278_v3  ;;  %vm374_vm3 = vcmask 9224  }
  0x94   :  { %v149_v60 = vpop.permute.xlu0 %148 }
  0x95   :  { %v150_v0 = vrot.slane %v149_v60, 1  ;;  %v512_v4 = vmul.f32 %v149_v60, %v54_v31  ;;  %v514_v9 = vmul.f32 %v149_v60, %v60_v32  ;;  %v155_v16 = vmul.f32 %v149_v60, %v66_v35 }
  0x96   :  { %v522_v19 = vmul.f32 %v149_v60, %v72_v36  ;;  %v524_v20 = vmul.f32 %v149_v60, %v78_v37  ;;  %v526_v22 = vmul.f32 %v149_v60, %v84_v43  ;;  %v533_v36 = vmul.f32 %v149_v60, %v90_v44 }
  0x97   :  { %v161_v10 = vmul.f32 %v150_v0, %v102_v47  ;;  %v162_v11 = vmul.f32 %v150_v0, %v108_v48  ;;  %v163_v12 = vmul.f32 %v150_v0, %v114_v52  ;;  %v164_v13 = vmul.f32 %v150_v0, %v120_v56 }
  0x98   :  { %v165_v21 = vmul.f32 %v150_v0, %v126_v57  ;;  %v516_v14 = vmul.f32 %v150_v0, %v132_v58  ;;  %v518_v15 = vmul.f32 %v150_v0, %v138_v59  ;;  %v520_v17 = vmul.f32 %v150_v0, %v144_v61 }
  0x99   :  { %v288_v23 = vmul.f32 %v251_v62, %v512_v4  ;;  %v289_v24 = vmul.f32 %v255_v1, %v514_v9  ;;  %v296_v25 = vmul.f32 %v251_v62, %v161_v10  ;;  %v297_v26 = vmul.f32 %v255_v1, %v162_v11 }
  0x9a   :  { %v298_v27 = vmul.f32 %v259_v2, %v163_v12  ;;  %v299_v28 = vmul.f32 %v263_v5, %v164_v13  ;;  %v300_v29 = vmul.f32 %v267_v6, %v165_v21  ;;  %v301_v30 = vmul.f32 %v271_v7, %v516_v14 }
  0x9b   :  { %v302_v31 = vmul.f32 %v275_v8, %v518_v15  ;;  %v303_v32 = vmul.f32 %v279_v18, %v520_v17  ;;  %v320_v33 = vrot.slane %v296_v25, 7  ;;  %v322_v34 = vrot.slane %v297_v26, 7 }
  0x9c   :  { %v324_v35 = vrot.slane %v298_v27, 7  ;;  %v290_v37 = vmul.f32 %v259_v2, %v155_v16  ;;  %v326_v38 = vrot.slane %v299_v28, 7  ;;  %v328_v39 = vrot.slane %v300_v29, 7 }
  0x9d   :  { %v535_v40 = vmul.f32 %v149_v60, %v96_v45  ;;  %v291_v41 = vmul.f32 %v263_v5, %v522_v19  ;;  %v321_v42 = vsel %vm202_vm0, %v320_v33, %v288_v23  ;;  %v323_v43 = vsel %vm202_vm0, %v322_v34, %v289_v24 }
  0x9e   :  { %v292_v46 = vmul.f32 %v267_v6, %v524_v20  ;;  %v325_v47 = vsel %vm202_vm0, %v324_v35, %v290_v37  ;;  %v330_v48 = vrot.slane %v301_v30, 7  ;;  %v332_v49 = vrot.slane %v302_v31, 7 }
  0x9f   :  { %v293_v44 = vmul.f32 %v271_v7, %v526_v22  ;;  %v334_v50 = vrot.slane %v303_v32, 7  ;;  %v344_v51 = vsel %vm226_vm1, %v321_v42, 0.0  ;;  %v345_v45 = vsel %vm226_vm1, %v323_v43, 0.0 }
  0xa0   :  { %v294_v52 = vmul.f32 %v275_v8, %v533_v36  ;;  %v327_v53 = vsel %vm202_vm0, %v326_v38, %v291_v41  ;;  %v329_v54 = vsel %vm202_vm0, %v328_v39, %v292_v46  ;;  %v346_v55 = vadd.f32 %v345_v45, %v344_v51 }
  0xa1   :  { %v295_v56 = vmul.f32 %v279_v18, %v535_v40  ;;  %v347_v57 = vsel %vm226_vm1, %v325_v47, 0.0  ;;  %v331_v58 = vsel %vm202_vm0, %v330_v48, %v293_v44  ;;  %v349_v62 = vsel %vm226_vm1, %v327_v53, 0.0 }
  0xa2   :  { %v333_v59 = vsel %vm202_vm0, %v332_v49, %v294_v52  ;;  %v348_v60 = vadd.f32 %v347_v57, %v346_v55  ;;  %v351_v63 = vsel %vm226_vm1, %v329_v54, 0.0  ;;  %v177_v0 = vmul.f32 %v161_v10, %v161_v10 }
  0xa3   :  { %v335_v61 = vsel %vm202_vm0, %v334_v50, %v295_v56  ;;  %v178_v2 = vmul.f32 %v162_v11, %v162_v11  ;;  %v179_v3 = vmul.f32 %v163_v12, %v163_v12  ;;  %v180_v5 = vmul.f32 %v164_v13, %v164_v13 }
  0xa4   :  { %v350_v1 = vadd.f32 %v349_v62, %v348_v60  ;;  %v353_v6 = vsel %vm226_vm1, %v331_v58, 0.0  ;;  %v169_v7 = vmul.f32 %v512_v4, %v512_v4  ;;  %v170_v8 = vmul.f32 %v514_v9, %v514_v9 }
  0xa5   :  { %v181_v18 = vmul.f32 %v165_v21, %v165_v21  ;;  %v201_v24 = vrot.slane %v177_v0, 7  ;;  %v204_v25 = vrot.slane %v178_v2, 7  ;;  %v206_v26 = vrot.slane %v179_v3, 7 }
  0xa6   :  { %v352_v23 = vadd.f32 %v351_v63, %v350_v1  ;;  %v355_v27 = vsel %vm226_vm1, %v333_v59, 0.0  ;;  %v171_v10 = vmul.f32 %v155_v16, %v155_v16  ;;  %v182_v11 = vmul.f32 %v516_v14, %v516_v14 }
  0xa7   :  { %v208_v12 = vrot.slane %v180_v5, 7  ;;  %v357_v28 = vsel %vm226_vm1, %v335_v61, 0.0  ;;  %v203_v4 = vsel %vm202_vm0, %v201_v24, %v169_v7  ;;  %v205_v29 = vsel %vm202_vm0, %v204_v25, %v170_v8 }
  0xa8   :  { %v354_v13 = vadd.f32 %v353_v6, %v352_v23  ;;  %v172_v9 = vmul.f32 %v522_v19, %v522_v19  ;;  %v183_v21 = vmul.f32 %v518_v15, %v518_v15  ;;  %v207_v30 = vsel %vm202_vm0, %v206_v26, %v171_v10 }
  0xa9   :  { %v210_v16 = vrot.slane %v181_v18, 7  ;;  %v173_v14 = vmul.f32 %v524_v20, %v524_v20  ;;  %v227_v32 = vsel %vm226_vm1, %v203_v4, 0.0  ;;  %v228_v33 = vsel %vm226_vm1, %v205_v29, 0.0 }
  0xaa   :  { %v356_v31 = vadd.f32 %v355_v27, %v354_v13  ;;  %v184_v34 = vmul.f32 %v520_v17, %v520_v17  ;;  %v209_v35 = vsel %vm202_vm0, %v208_v12, %v172_v9  ;;  %v212_v19 = vrot.slane %v182_v11, 7 }
  0xab   :  { %v229_v37 = vadd.f32 %v228_v33, %v227_v32  ;;  %v230_v15 = vsel %vm226_vm1, %v207_v30, 0.0  ;;  %v174_v39 = vmul.f32 %v526_v22, %v526_v22  ;;  %v211_v41 = vsel %vm202_vm0, %v210_v16, %v173_v14 }
  0xac   :  { %v358_v38 = vadd.f32 %v357_v28, %v356_v31  ;;  %v214_v20 = vrot.slane %v183_v21, 7  ;;  %v232_v43 = vsel %vm226_vm1, %v209_v35, 0.0  ;;  %v175_v17 = vmul.f32 %v533_v36, %v533_v36 }
  0xad   :  { %v231_v42 = vadd.f32 %v230_v15, %v229_v37  ;;  %v213_v46 = vsel %vm202_vm0, %v212_v19, %v174_v39  ;;  %v216_v47 = vrot.slane %v184_v34, 7  ;;  %v234_v49 = vsel %vm226_vm1, %v211_v41, 0.0 }
  0xae   :  { %359 = vadd.xlane.f32.xlu1 %v358_v38  ;;  %v176_v44 = vmul.f32 %v535_v40, %v535_v40  ;;  %v215_v22 = vsel %vm202_vm0, %v214_v20, %v175_v17  ;;  %v236_v51 = vsel %vm226_vm1, %v213_v46, 0.0  ;;  %v363_v59 = vstv %s612_s3 }
  0xaf   :  { %v233_v48 = vadd.f32 %v232_v43, %v231_v42  ;;  %v238_v53 = vsel %vm226_vm1, %v215_v22, 0.0 }
  0xb0   :  { %v217_v45 = vsel %vm202_vm0, %v216_v47, %v176_v44 }
  0xb1   :  { %v235_v50 = vadd.f32 %v234_v49, %v233_v48  ;;  %v240_v54 = vsel %vm226_vm1, %v217_v45, 0.0 }
  0xb3   :  { %v237_v52 = vadd.f32 %v236_v51, %v235_v50 }
  0xb5   :  { %v239_v36 = vadd.f32 %v238_v53, %v237_v52 }
  0xb7   :  { %v241_v55 = vadd.f32 %v240_v54, %v239_v36 }
  0xb9   :  { %242 = vadd.xlane.f32.xlu0 %v241_v55 }
 0x13b   :  { %v360_v40 = vpop.xlane.xlu1 %359 }
 0x146   :  { %v243_v56 = vpop.xlane.xlu0 %242 }
 0x147   :  { %v244_v57 = vmax.f32 %v243_v56, 1e-24 }
 0x149   :  { %398 = vrsqrt.f32 %v244_v57 }
 0x153   :  { %v399_v58 = vpop.eup %398 }
 0x154   :  { %v361_v60 = vmul.f32 %v399_v58, %v360_v40 }
 0x156   :  { %v364_v61 = vadd.f32 %v363_v59, %v361_v60 }
 0x158   :  { %v391_v62 = vmul.f32 -1.442695, %v364_v61 }
 0x15a   :  { %400 = vpow2.f32 %v391_v62 }
 0x164   :  { %v401_v63 = vpop.eup %400 }
 0x165   :  { %v368_v0 = vadd.f32 1.0, %v401_v63 }
 0x167   :  { %402 = vrcp.f32 %v368_v0 }
 0x171   :  { %v403_v1 = vpop.eup %402 }
 0x172   :  { %v371_v2 = vsub.f32 1.0, %v403_v1  ;;  %373 = vst.msk [vmem:[#allocation6] sm:$0x3] %vm372_vm2, %v403_v1 }
 0x174   :  { %375 = vst.msk [vmem:[#allocation6] sm:$0x3] %vm374_vm3, %v371_v2 }
 0x175   :  { %437 = shalt.err (!%p434_p12)
}
 0x176   :  { %s438_s10 = scalar_lea.hbm %s613_s4, 32 }
 0x177   :  { %p439_p13 = scmp.ne.s32.totalorder %s613_s4, %s438_s10  ;;  %p442_p0 = scmp.lt.u32.totalorder %s438_s10, %s613_s4 }
 0x179   :  { %p444_p1 = pnand %p442_p0, %p439_p13 }
 0x17b   :  { %447 = shalt.err (!%p444_p1)
}
 0x17c   :  { %385 = dma.vmem_to_hbm [thread:$0]  %s383_s7, 32, %s613_s4, [#allocation5]  }
 0x17d   :  { %450 = dma.done.wait [#allocation5], 32  }
 0x17e   :  { %451 = vsyncadd [#allocation5], 4294967264 }
 0x17f   :  { %389 = vsyncpa [#allocation4], 1 }
 0x180   :  { %390 = vsyncpa [#allocation5], 1 }

</bundles_post_ra>
